<compile_context>
chip_gen: v5e
topology: v5e:2x2
jax: 0.10.0
libtpu: 0.0.40
codegen_flags: <defaults>
</compile_context>

<pallas_src>
import math
import numpy as np
import jax
import jax.numpy as jnp
from jax.experimental import pallas as pl
from jax.experimental.pallas import tpu as pltpu


# ---------------------------------------------------------------------------
# Constant tables / parameter preprocessing (done once, like register_buffer).
# ---------------------------------------------------------------------------

def _sinusoid_table(n_position, d_hid):
    """Sinusoid position encoding table, (n_position, d_hid); matches PyTorch ref."""
    hid = np.arange(d_hid)
    denom = 1.0 / np.power(10000.0, 2.0 * (hid // 2) / d_hid)
    pos = np.arange(n_position, dtype=np.float64)[:, None]
    table = pos * denom[None, :]
    table[:, 0::2] = np.sin(table[:, 0::2])
    table[:, 1::2] = np.cos(table[:, 1::2])
    return jnp.asarray(table, dtype=jnp.float32)


def make_fused_pe_table(h_table, w_table, H, W):
    """Fused positional-encoding constant, shape (2C, H*W).

    Rows [0:C]   : h_pos_enc broadcast over W  -> pe[c, h*W + w] = h_table[h, c]
    Rows [C:2C]  : w_pos_enc broadcast over H  -> pe[c, h*W + w] = w_table[w, c]
    Precomputed once outside the kernel (it only depends on H, W, C).
    """
    C = h_table.shape[1]
    hpe = jnp.broadcast_to(h_table[:H, :].T[:, :, None], (C, H, W)).reshape(C, H * W)
    wpe = jnp.broadcast_to(w_table[:W, :].T[:, None, :], (C, H, W)).reshape(C, H * W)
    return jnp.concatenate([hpe, wpe], axis=0)                      # (2C, H*W)


def fuse_scale_params(raw):
    """Fuse the two scale-factor MLPs (h and w branches) into 2 matmuls.

    1x1 convs on a (B, C, 1, 1) tensor are (C_in -> C_out) matmuls; weights are
    stored as (C_in, C_out) so `pooled @ W + b` == PyTorch Conv2d(k=1).
    First layers are concatenated along the output dim; second layers become a
    block-diagonal (2C, 2C) matrix, numerically identical to two branches.
    """
    C = raw["h_w1"].shape[0]
    dt = raw["h_w1"].dtype
    w1_cat = jnp.concatenate([raw["h_w1"], raw["w_w1"]], axis=1)    # (C, 2C)
    b1_cat = jnp.concatenate([raw["h_b1"], raw["w_b1"]], axis=1)    # (1, 2C)
    w2_bd = jnp.zeros((2 * C, 2 * C), dt)
    w2_bd = w2_bd.at[:C, :C].set(raw["h_w2"]).at[C:, C:].set(raw["w_w2"])
    b2_cat = jnp.concatenate([raw["h_b2"], raw["w_b2"]], axis=1)    # (1, 2C)
    return {"w1_cat": w1_cat, "b1_cat": b1_cat, "w2_bd": w2_bd, "b2_cat": b2_cat}


# ---------------------------------------------------------------------------
# Pallas kernel
# ---------------------------------------------------------------------------

def _make_ape_kernel(inv_hw):
    """inv_hw = 1 / (real H*W); uses sum * inv_hw so zero lane-padding never
    perturbs the pooled mean."""

    def _ape_kernel(x_ref, w1_ref, b1_ref, w2_ref, b2_ref, pe_ref, out_ref):
        # x block: (Bt, C, HWp) f32 -- channels on sublanes, spatial on lanes.
        x = x_ref[...]
        C = x.shape[1]

        # AdaptiveAvgPool2d(1): mean over the spatial (lane) axis -> (Bt, C).
        pooled = jnp.sum(x, axis=-1) * inv_hw

        # Fused scale MLPs: one (Bt,C)@(C,2C) and one (Bt,2C)@(2C,2C) matmul.
        hidden = jnp.maximum(
            jnp.dot(pooled, w1_ref[...], preferred_element_type=jnp.float32)
            + b1_ref[...], 0.0)
        scales = jax.nn.sigmoid(
            jnp.dot(hidden, w2_ref[...], preferred_element_type=jnp.float32)
            + b2_ref[...])                                          # (Bt, 2C)

        # Lane-dense combine, no (Bt, 2C, HWp) intermediate: each product term
        # is only x-block-sized, and the split of `scales` / `pe` into h/w
        # halves is a cheap slice of tiny / resident operands.
        pe = pe_ref[...]                                            # (2C, HWp)
        h_scale = scales[:, :C, None]                               # (Bt, C, 1)
        w_scale = scales[:, C:, None]                               # (Bt, C, 1)

        # TODO(synk): dropout omitted (identity at inference); train-mode dropout
        # would use pltpu.prng_seed / pltpu.prng_random_bits.
        out_ref[...] = (x
                        + h_scale * pe[None, :C, :]
                        + w_scale * pe[None, C:, :])

    return _ape_kernel


def _vmem_budget_bytes():
    """Generation-aware usable-VMEM budget (conservative)."""
    try:
        cap = pltpu.get_tpu_info().vmem_capacity_bytes
    except Exception:
        cap = 64 * 1024 * 1024          # assume the smallest (v7x per-TC) if unknown
    # Leave headroom; never ask for more than ~48 MiB even on 128 MiB chips.
    return min(int(cap * 0.75), 48 * 1024 * 1024)


def adaptive_2d_positional_encoding(x_nchw, fused_params, pe_cat):
    """x_nchw: (B, C, H, W) float32. Returns (B, C, H, W). No layout transposes."""
    B, C, H, W = x_nchw.shape
    HW = H * W
    HWp = ((HW + 127) // 128) * 128     # lane-pad so stores are unmasked
    itemsize = jnp.dtype(x_nchw.dtype).itemsize

    x = x_nchw.reshape(B, C, HW)        # free reshape on contiguous NCHW
    pe = pe_cat
    if HWp != HW:
        x = jnp.pad(x, ((0, 0), (0, 0), (0, HWp - HW)))
        pe = jnp.pad(pe, ((0, 0), (0, HWp - HW)))

    # --- Tile sizing ------------------------------------------------------
    # Per grid step, VMEM holds: 2x in-buffers + 2x out-buffers of the x block,
    # ~2 block-sized compute intermediates, plus the (small) resident constants.
    # Budget ~1/8 of usable VMEM per x block.
    vmem_budget = _vmem_budget_bytes()
    bytes_per_batch_row = C * HWp * itemsize
    block_budget = max(bytes_per_batch_row, vmem_budget // 8)
    Bt = max(1, min(B, block_budget // bytes_per_batch_row))
    # Force a multi-step grid (>= min(B, 4) steps) so the pipeline can overlap
    # prefetch/compute/writeback and v7x's two TCs can split the batch axis.
    target_steps = min(B, 4)
    Bt = max(1, min(Bt, pl.cdiv(B, target_steps)))
    grid = (pl.cdiv(B, Bt),)

    const_bytes = (fused_params["w1_cat"].size + fused_params["b1_cat"].size
                   + fused_params["w2_bd"].size + fused_params["b2_cat"].size
                   + pe.size) * itemsize
    # Ask Mosaic for enough scoped VMEM for the buffers we actually use
    # (v5e's 16 MiB default is otherwise the limiter), capped by the budget.
    needed = 8 * Bt * bytes_per_batch_row + 2 * const_bytes + (1 << 20)
    vmem_limit = int(min(vmem_budget, max(needed, 8 << 20)))

    out = pl.pallas_call(
        _make_ape_kernel(1.0 / float(HW)),
        out_shape=jax.ShapeDtypeStruct((B, C, HWp), x.dtype),
        grid=grid,
        in_specs=[
            pl.BlockSpec((Bt, C, HWp), lambda i: (i, 0, 0)),         # x
            pl.BlockSpec((C, 2 * C), lambda i: (0, 0)),              # w1_cat
            pl.BlockSpec((1, 2 * C), lambda i: (0, 0)),              # b1_cat
            pl.BlockSpec((2 * C, 2 * C), lambda i: (0, 0)),          # w2_bd
            pl.BlockSpec((1, 2 * C), lambda i: (0, 0)),              # b2_cat
            pl.BlockSpec((2 * C, HWp), lambda i: (0, 0)),            # fused PE table
        ],
        out_specs=pl.BlockSpec((Bt, C, HWp), lambda i: (i, 0, 0)),
        # NOTE: no input_output_aliases -- x is not donated by this caller, and
        # the defensive copy XLA would insert doubles HBM traffic.
        compiler_params=pltpu.CompilerParams(
            dimension_semantics=("parallel",),
            vmem_limit_bytes=vmem_limit,
        ),
    )(x, fused_params["w1_cat"], fused_params["b1_cat"],
      fused_params["w2_bd"], fused_params["b2_cat"], pe)

    if HWp != HW:
        out = out[:, :, :HW]
    return out.reshape(B, C, H, W)      # free reshape back to NCHW


# ---------------------------------------------------------------------------
# Pure-JAX reference (mirrors the PyTorch forward, eval mode) + test harness.
# ---------------------------------------------------------------------------

def _reference_forward(x_nchw, raw_params, h_table, w_table):
    B, C, H, W = x_nchw.shape
    pooled = jnp.mean(x_nchw, axis=(2, 3))                           # (B, C)

    def mlp(prefix):
        h = jnp.maximum(pooled @ raw_params[prefix + "_w1"] + raw_params[prefix + "_b1"], 0.0)
        return jax.nn.sigmoid(h @ raw_params[prefix + "_w2"] + raw_params[prefix + "_b2"])

    h_scale = mlp("h")                                               # (B, C)
    w_scale = mlp("w")
    h_term = h_scale[:, :, None, None] * h_table[:H, :].T[None, :, :, None]
    w_term = w_scale[:, :, None, None] * w_table[:W, :].T[None, :, None, :]
    return x_nchw + h_term + w_term


if __name__ == "__main__":
    # Small shapes consistent with the module: d_hid == channel dim of x.
    B, C, H, W = 2, 32, 16, 16          # d_hid=32
    n_height, n_width = 32, 32          # max 2D feature size; sliced to (:h, :w)

    key = jax.random.PRNGKey(0)
    keys = jax.random.split(key, 9)
    x = jax.random.normal(keys[0], (B, C, H, W), dtype=jnp.float32)

    def conv_w(k):
        return (jax.random.normal(k, (C, C), dtype=jnp.float32) / np.sqrt(C)).astype(jnp.float32)

    raw_params = {
        "h_w1": conv_w(keys[1]),
        "h_b1": 0.01 * jax.random.normal(keys[2], (1, C), dtype=jnp.float32),
        "h_w2": conv_w(keys[3]),
        "h_b2": 0.01 * jax.random.normal(keys[4], (1, C), dtype=jnp.float32),
        "w_w1": conv_w(keys[5]),
        "w_b1": 0.01 * jax.random.normal(keys[6], (1, C), dtype=jnp.float32),
        "w_w2": conv_w(keys[7]),
        "w_b2": 0.01 * jax.random.normal(keys[8], (1, C), dtype=jnp.float32),
    }

    # One-time setup (register_buffer analog): sinusoid tables, fused PE table,
    # fused scale-MLP weights.
    h_table = _sinusoid_table(n_height, C)                 # (n_height, C)
    w_table = _sinusoid_table(n_width, C)                  # (n_width, C)
    pe_cat = make_fused_pe_table(h_table, w_table, H, W)   # (2C, H*W)
    fused_params = fuse_scale_params(raw_params)

    ref = _reference_forward(x, raw_params, h_table, w_table)
    ref = jax.block_until_ready(ref)

    fwd = jax.jit(adaptive_2d_positional_encoding)
    out = fwd(x, fused_params, pe_cat)
    out = jax.block_until_ready(out)

    assert out.shape == (B, C, H, W) and out.dtype == jnp.float32
    np.testing.assert_allclose(np.asarray(out), np.asarray(ref), rtol=1e-5, atol=1e-5)

    print("KERNEL_OK")
</pallas_src>

<mosaic_0001>
module attributes {stable_mosaic.version = 11 : i64} {
  func.func @_ape_kernel(%arg0: i32, %arg1: memref<1x32x256xf32, #tpu.memory_space<vmem>>, %arg2: memref<32x64xf32, #tpu.memory_space<vmem>>, %arg3: memref<1x64xf32, #tpu.memory_space<vmem>>, %arg4: memref<64x64xf32, #tpu.memory_space<vmem>>, %arg5: memref<1x64xf32, #tpu.memory_space<vmem>>, %arg6: memref<64x256xf32, #tpu.memory_space<vmem>>, %arg7: memref<1x32x256xf32, #tpu.memory_space<vmem>>) attributes {dimension_semantics = [#tpu.dimension_semantics<parallel>], iteration_bounds = array<i64: 2>, scalar_prefetch = 0 : i64, scratch_operands = 0 : i64, tpu.core_type = #tpu.core_type<tc>, window_params = [{transform_indices = @transform_0, window_bounds = array<i64: 1, 32, 256>}, {pipeline_mode = #tpu.pipeline_mode<synchronous>, transform_indices = @transform_1, window_bounds = array<i64: 32, 64>}, {pipeline_mode = #tpu.pipeline_mode<synchronous>, transform_indices = @transform_2, window_bounds = array<i64: 1, 64>}, {pipeline_mode = #tpu.pipeline_mode<synchronous>, transform_indices = @transform_3, window_bounds = array<i64: 64, 64>}, {pipeline_mode = #tpu.pipeline_mode<synchronous>, transform_indices = @transform_4, window_bounds = array<i64: 1, 64>}, {pipeline_mode = #tpu.pipeline_mode<synchronous>, transform_indices = @transform_5, window_bounds = array<i64: 64, 256>}, {transform_indices = @transform_6, window_bounds = array<i64: 1, 32, 256>}]} {
    %c0 = arith.constant 0 : index
    %c0_0 = arith.constant 0 : index
    %c0_1 = arith.constant 0 : index
    %0 = vector.load %arg1[%c0, %c0_0, %c0_1] : memref<1x32x256xf32, #tpu.memory_space<vmem>>, vector<1x32x256xf32>
    %cst = arith.constant dense<0.000000e+00> : vector<1x32xf32>
    %1 = vector.multi_reduction <add>, %0, %cst [2] : vector<1x32x256xf32> to vector<1x32xf32>
    %cst_2 = arith.constant 3.906250e-03 : f32
    %2 = vector.broadcast %cst_2 : f32 to vector<1x32xf32>
    %3 = arith.mulf %1, %2 : vector<1x32xf32>
    %c0_3 = arith.constant 0 : index
    %c0_4 = arith.constant 0 : index
    %4 = vector.load %arg2[%c0_3, %c0_4] : memref<32x64xf32, #tpu.memory_space<vmem>>, vector<32x64xf32>
    %cst_5 = arith.constant dense<0.000000e+00> : vector<1x64xf32>
    %5 = tpu.matmul %3, %4, %cst_5 {dimension_numbers = #tpu.dot_dimension_numbers<[1], [0], [0], [1], [0, 0, 1, 1], [], []>} : vector<1x32xf32>, vector<32x64xf32>, vector<1x64xf32> -> vector<1x64xf32>
    %c0_6 = arith.constant 0 : index
    %c0_7 = arith.constant 0 : index
    %6 = vector.load %arg3[%c0_6, %c0_7] : memref<1x64xf32, #tpu.memory_space<vmem>>, vector<1x64xf32>
    %7 = arith.addf %5, %6 : vector<1x64xf32>
    %cst_8 = arith.constant 0.000000e+00 : f32
    %8 = vector.broadcast %cst_8 : f32 to vector<1x64xf32>
    %9 = arith.maximumf %7, %8 : vector<1x64xf32>
    %c0_9 = arith.constant 0 : index
    %c0_10 = arith.constant 0 : index
    %10 = vector.load %arg4[%c0_9, %c0_10] : memref<64x64xf32, #tpu.memory_space<vmem>>, vector<64x64xf32>
    %cst_11 = arith.constant dense<0.000000e+00> : vector<1x64xf32>
    %11 = tpu.matmul %9, %10, %cst_11 {dimension_numbers = #tpu.dot_dimension_numbers<[1], [0], [0], [1], [0, 0, 1, 1], [], []>} : vector<1x64xf32>, vector<64x64xf32>, vector<1x64xf32> -> vector<1x64xf32>
    %c0_12 = arith.constant 0 : index
    %c0_13 = arith.constant 0 : index
    %12 = vector.load %arg5[%c0_12, %c0_13] : memref<1x64xf32, #tpu.memory_space<vmem>>, vector<1x64xf32>
    %13 = arith.addf %11, %12 : vector<1x64xf32>
    %14 = arith.negf %13 : vector<1x64xf32>
    %15 = math.exp %14 : vector<1x64xf32>
    %cst_14 = arith.constant 1.000000e+00 : f32
    %16 = vector.broadcast %cst_14 : f32 to vector<1x64xf32>
    %17 = arith.addf %16, %15 : vector<1x64xf32>
    %18 = arith.divf %16, %17 : vector<1x64xf32>
    %c0_15 = arith.constant 0 : index
    %c0_16 = arith.constant 0 : index
    %19 = vector.load %arg6[%c0_15, %c0_16] : memref<64x256xf32, #tpu.memory_space<vmem>>, vector<64x256xf32>
    %20 = vector.extract_strided_slice %18 {offsets = [0, 0], sizes = [1, 32], strides = [1, 1]} : vector<1x64xf32> to vector<1x32xf32>
    %21 = vector.shape_cast %20 : vector<1x32xf32> to vector<1x32x1xf32>
    %22 = vector.extract_strided_slice %18 {offsets = [0, 32], sizes = [1, 32], strides = [1, 1]} : vector<1x64xf32> to vector<1x32xf32>
    %23 = vector.shape_cast %22 : vector<1x32xf32> to vector<1x32x1xf32>
    %24 = vector.extract_strided_slice %19 {offsets = [0, 0], sizes = [32, 256], strides = [1, 1]} : vector<64x256xf32> to vector<32x256xf32>
    %25 = vector.shape_cast %24 : vector<32x256xf32> to vector<1x32x256xf32>
    %26 = vector.broadcast %21 : vector<1x32x1xf32> to vector<1x32x256xf32>
    %27 = arith.mulf %26, %25 : vector<1x32x256xf32>
    %28 = arith.addf %0, %27 : vector<1x32x256xf32>
    %29 = vector.extract_strided_slice %19 {offsets = [32, 0], sizes = [32, 256], strides = [1, 1]} : vector<64x256xf32> to vector<32x256xf32>
    %30 = vector.shape_cast %29 : vector<32x256xf32> to vector<1x32x256xf32>
    %31 = vector.broadcast %23 : vector<1x32x1xf32> to vector<1x32x256xf32>
    %32 = arith.mulf %31, %30 : vector<1x32x256xf32>
    %33 = arith.addf %28, %32 : vector<1x32x256xf32>
    %c0_17 = arith.constant 0 : index
    %c0_18 = arith.constant 0 : index
    %c0_19 = arith.constant 0 : index
    %34 = vector.load %arg7[%c0_17, %c0_18, %c0_19] : memref<1x32x256xf32, #tpu.memory_space<vmem>>, vector<1x32x256xf32>
    tpu.vector_store %arg7[%c0_17, %c0_18, %c0_19], %33 {strides = array<i32>} : memref<1x32x256xf32, #tpu.memory_space<vmem>>, vector<1x32x256xf32>,
    return
  }
  func.func @transform_0(%arg0: i32) -> (i32, i32, i32) {
    %c0_i32 = arith.constant 0 : i32
    %c0_i32_0 = arith.constant 0 : i32
    %c0_i32_1 = arith.constant 0 : i32
    return %arg0, %c0_i32, %c0_i32_0 : i32, i32, i32
  }
  func.func @transform_1(%arg0: i32) -> (i32, i32) {
    %c0_i32 = arith.constant 0 : i32
    %c0_i32_0 = arith.constant 0 : i32
    %c0_i32_1 = arith.constant 0 : i32
    return %c0_i32, %c0_i32_0 : i32, i32
  }
  func.func @transform_2(%arg0: i32) -> (i32, i32) {
    %c0_i32 = arith.constant 0 : i32
    %c0_i32_0 = arith.constant 0 : i32
    %c0_i32_1 = arith.constant 0 : i32
    return %c0_i32, %c0_i32_0 : i32, i32
  }
  func.func @transform_3(%arg0: i32) -> (i32, i32) {
    %c0_i32 = arith.constant 0 : i32
    %c0_i32_0 = arith.constant 0 : i32
    %c0_i32_1 = arith.constant 0 : i32
    return %c0_i32, %c0_i32_0 : i32, i32
  }
  func.func @transform_4(%arg0: i32) -> (i32, i32) {
    %c0_i32 = arith.constant 0 : i32
    %c0_i32_0 = arith.constant 0 : i32
    %c0_i32_1 = arith.constant 0 : i32
    return %c0_i32, %c0_i32_0 : i32, i32
  }
  func.func @transform_5(%arg0: i32) -> (i32, i32) {
    %c0_i32 = arith.constant 0 : i32
    %c0_i32_0 = arith.constant 0 : i32
    %c0_i32_1 = arith.constant 0 : i32
    return %c0_i32, %c0_i32_0 : i32, i32
  }
  func.func @transform_6(%arg0: i32) -> (i32, i32, i32) {
    %c0_i32 = arith.constant 0 : i32
    %c0_i32_0 = arith.constant 0 : i32
    %c0_i32_1 = arith.constant 0 : i32
    return %arg0, %c0_i32, %c0_i32_0 : i32, i32, i32
  }
}

</mosaic_0001>

<bundles_post_ra>
// kernel: adaptive_2d_positional_encoding.1
= control target key start
LH: loop header
LB: loop body
LE: loop exit
PB: predicated region body
PF: predicated region fallthrough
CT: control target
= control target key end

     0   :  { %s616_s21 = smov 0   ;;  %s782_s0 = inlined_call_operand.vmem [shape: f32[2,32,256], index: 0, kind: input, shape index: {}]   ;;  %s783_s1 = inlined_call_operand.vmem [shape: f32[32,64], index: 1, kind: input, shape index: {}]   ;;  %s784_s2 = inlined_call_operand.vmem [shape: f32[1,64], index: 2, kind: input, shape index: {}]   ;;  %s785_s3 = inlined_call_operand.vmem [shape: f32[64,64], index: 3, kind: input, shape index: {}]   ;;  %s786_s4 = inlined_call_operand.vmem [shape: f32[1,64], index: 4, kind: input, shape index: {}]   ;;  %s787_s5 = inlined_call_operand.vmem [shape: f32[64,256], index: 5, kind: input, shape index: {}]   ;;  %s788_s6 = inlined_call_operand.vmem [shape: f32[2,32,256], index: 6, kind: output, shape index: {}]  }
   0x1 LB: > { %s536_s22 = sadd.s32 4294967295, %s579_s21   ;;  %p540_p0 = scmp.ge.s32.totalorder %s579_s21, 1  ;;  %s579_s21 = sphi %s616_s21, %s16_s21  }
   0x2   : > { %p212_p1 = scmp.lt.s32.totalorder %s579_s21, 3 }
   0x4   : > { %p213_p2 = pnand %p540_p0, %p212_p1 }
   0x5   : > { %p242_p3 = scmp.lt.s32.totalorder (!%p213_p2), %s536_s22, 1 }
   0x6   : > { %216 = sbr.rel (%p213_p2) target bundleno = 614 (0x266), region = 44 }
   0xb   : > { %v285_v0 = vlaneseq  ;;  %s790_s22 = smov (!%p242_p3, %s536_s22), 1  ;;  %v279_v14 = vld [vmem:[%s783_s1 + $0x18] sm:$0xff]  ;;  %v278_v15 = vld [vmem:[%s783_s1 + $0x10] sm:$0xff]  ;;  %v277_v16 = vld [vmem:[%s783_s1 + $0x8] sm:$0xff]  ;;  %vm290_vm0 = vcmask 130112   ;;  %vm294_vm1 = vcmask 195712  }
   0xc   : > { %s550_s23 = sshll.u32 %s790_s22, 6  ;;  %315 = vmatpush.msra.mxu0 %v279_v14  ;;  %v276_v17 = vld [vmem:[%s783_s1] sm:$0xff]  ;;  %v331_v18 = vld [vmem:[%s785_s3 + $0x38] sm:$0xff]  ;;  %v330_v19 = vld [vmem:[%s785_s3 + $0x30] sm:$0xff]  ;;  %vm298_vm2 = vcmask 261312   ;;  %vm300_vm3 = vcmask 261120  }
   0xd   : > { %v626_v1 = vshrl.u32 %v285_v0, 7  ;;  %s246_s26 = scalar_lea.vmem %s782_s0, %s550_s23  ;;  %345 = vmatpush.msra.mxu1 %v331_v18  ;;  %v329_v20 = vld [vmem:[%s785_s3 + $0x28] sm:$0xff]  ;;  %v328_v21 = vld [vmem:[%s785_s3 + $0x20] sm:$0xff]  ;;  %v327_v22 = vld [vmem:[%s785_s3 + $0x18] sm:$0xff]  ;;  %v286_v25 = vand.u32 127, %v285_v0  ;;  %vm333_vm4 = vcmask 523264   ;;  %s727_s20 = scalar_lea.vmem %s788_s6, %s550_s23 }
   0xe   : > { %v635_v2 = vld [vmem:[%s246_s26] sm:$0xff]  ;;  %v637_v3 = vld [vmem:[%s246_s26 + $0x8] sm:$0xff]  ;;  %v647_v8 = vld [vmem:[%s246_s26 + $0x10] sm:$0xff]  ;;  %316 = vmatpush.msra.mxu0 %v278_v15 }
   0xf   : > { %560 = vset.pattern.permute.xlu2 %v626_v1  ;;  %v639_v4 = vld [vmem:[%s246_s26 + $0x20] sm:$0xff]  ;;  %v260_v5 = vadd.f32 %v637_v3, %v635_v2  ;;  %v643_v6 = vld [vmem:[%s246_s26 + $0x28] sm:$0xff]  ;;  %v649_v9 = vld [vmem:[%s246_s26 + $0x18] sm:$0xff]  ;;  %346 = vmatpush.msra.mxu1 %v330_v19  ;;  %v288_v27 = vadd.s32 4294967288, %v286_v25  ;;  %v292_v28 = vadd.s32 4294967280, %v286_v25  ;;  %v296_v31 = vadd.s32 4294967272, %v286_v25 }
  0x10   : > { %v266_v7 = vadd.f32 %v643_v6, %v639_v4  ;;  %v651_v10 = vld [vmem:[%s246_s26 + $0x30] sm:$0xff]  ;;  %v653_v11 = vld [vmem:[%s246_s26 + $0x38] sm:$0xff]  ;;  %v263_v12 = vadd.f32 %v649_v9, %v647_v8  ;;  %317 = vmatpush.msra.mxu0 %v277_v16  ;;  %v325_v43 = vld [vmem:[%s785_s3 + $0x8] sm:$0xff]  ;;  %v413_v49 = vadd.s32 24, %v626_v1  ;;  %v407_v50 = vadd.s32 16, %v626_v1 }
  0x11   : > { %261 = vadd.xlane.f32.xlu0 %v260_v5  ;;  %v269_v13 = vadd.f32 %v653_v11, %v651_v10  ;;  %347 = vmatpush.msra.mxu1 %v329_v20  ;;  %v326_v42 = vld [vmem:[%s785_s3 + $0x10] sm:$0xff]  ;;  %v324_v44 = vld [vmem:[%s785_s3] sm:$0xff]  ;;  %v419_v14 = vadd.s32 32, %v626_v1  ;;  %v437_v15 = vadd.s32 56, %v626_v1  ;;  %v425_v16 = vadd.s32 40, %v626_v1 }
  0x12   : > { %267 = vadd.xlane.f32.xlu1 %v266_v7  ;;  %318 = vmatpush.msra.mxu0 %v276_v17  ;;  %v280_v45 = vld [vmem:[%s784_s2] sm:$0x1]  ;;  %v431_v17 = vadd.s32 48, %v626_v1 }
  0x13   : > { %348 = vmatpush.msra.mxu1 %v328_v21  ;;  %563 = vset.pattern.permute.xlu1 %v413_v49  ;;  %v332_v51 = vld [vmem:[%s786_s4] sm:$0x1]  ;;  %v377_v21 = vld [vmem:[%s787_s5 + $0x8] sm:$0xff] }
  0x14   : > { %562 = vset.pattern.permute.xlu0 %v407_v50  ;;  %v376_v20 = vld [vmem:[%s787_s5] sm:$0xff] }
  0x15   : > { %349 = vmatpush.msra.mxu1 %v327_v22 }
  0x17   : > { %350 = vmatpush.msra.mxu1 %v326_v42 }
  0x19   : > { %264 = vadd.xlane.f32.xlu0 %v263_v12  ;;  %351 = vmatpush.msra.mxu1 %v325_v43  ;;  %v380_v43 = vld [vmem:[%s787_s5 + $0x20] sm:$0xff] }
  0x1a   : > { %270 = vadd.xlane.f32.xlu1 %v269_v13  ;;  %v401_v13 = vadd.s32 8, %v626_v1  ;;  %v384_v1 = vld [vmem:[%s787_s5 + $0x40] sm:$0xff] }
  0x1b   : > { %352 = vmatpush.msra.mxu1 %v324_v44  ;;  %v381_v44 = vld [vmem:[%s787_s5 + $0x28] sm:$0xff] }
  0x84   : > { %v262_v23 = vpop.xlane.xlu0 %261 }
  0x85   : > { %v268_v24 = vpop.xlane.xlu1 %267  ;;  %v272_v26 = vmul.f32 0.00390625, %v262_v23 }
  0x86   : > { %v274_v29 = vmul.f32 0.00390625, %v268_v24  ;;  %v385_v24 = vld [vmem:[%s787_s5 + $0x48] sm:$0xff] }
  0x87   : > { %v287_v35 = vperm.slane %v272_v26, %v286_v25 }
  0x88   : > { %v293_v37 = vperm.slane %v274_v29, %v292_v28 }
  0x8c   : > { %v265_v30 = vpop.xlane.xlu0 %264 }
  0x8d   : > { %v273_v32 = vmul.f32 0.00390625, %v265_v30  ;;  %v271_v33 = vpop.xlane.xlu1 %270 }
  0x8e   : > { %v275_v34 = vmul.f32 0.00390625, %v271_v33 }
  0x8f   : > { %v289_v36 = vperm.slane %v273_v32, %v288_v27 }
  0x90   : > { %v297_v38 = vperm.slane %v275_v34, %v296_v31  ;;  %v386_v34 = vld [vmem:[%s787_s5 + $0x50] sm:$0xff] }
  0x91   : > { %v291_v39 = vsel %vm290_vm0, %v289_v36, %v287_v35  ;;  %v387_v35 = vld [vmem:[%s787_s5 + $0x58] sm:$0xff] }
  0x92   : > { %v295_v40 = vsel %vm294_vm1, %v293_v37, %v291_v39 }
  0x93   : > { %v299_v41 = vsel %vm298_vm2, %v297_v38, %v295_v40 }
  0x94   : > { %545 = vmatmul.msk.f32.vlgmr.msra.gmra.mxu0 %vm300_vm3, %v299_v41 }
 0x111   : > { %v320_v46 = vpop.f32.mrf.mxu0 }
 0x112   : > { %v321_v47 = vadd.f32 %v320_v46, %v280_v45 }
 0x114   : > { %v323_v48 = vmax.f32 %v321_v47, 0.0  ;;  %v389_v47 = vld [vmem:[%s787_s5 + $0x68] sm:$0xff] }
 0x116   : > { %546 = vmatmul.msk.f32.vlgmr.msra.gmra.mxu1 %vm333_vm4, %v323_v48 }
 0x193   : > { %v354_v52 = vpop.f32.mrf.mxu1 }
 0x194   : > { %v355_v53 = vadd.f32 %v354_v52, %v332_v51 }
 0x196   : > { %v547_v54 = vmul.f32 -1.442695, %v355_v53 }
 0x198   : > { %569 = vpow2.f32 %v547_v54 }
 0x19e   : > { %v570_v55 = vpop.eup %569 }
 0x19f   : > { %v360_v56 = vadd.f32 1.0, %v570_v55  ;;  %v382_v55 = vld [vmem:[%s787_s5 + $0x30] sm:$0xff] }
 0x1a1   : > { %571 = vrcp.f32 %v360_v56  ;;  %v372_v60 = vand.u32 2147483648, %v360_v56  ;;  %v370_v62 = vand.u32 2147483647, %v360_v56  ;;  %vm366_vm6 = vweird.f32 %v360_v56 }
 0x1a3   : > { %v373_v0 = vor.u32 1.1754944e-38, %v372_v60  ;;  %vm371_vm8 = vcmp.eq.f32.partialorder %v370_v62, 8.507059e+37 }
 0x1a7   : > { %v572_v57 = vpop.eup %571 }
 0x1a8   : > { %v362_v58 = vmul.f32 %v572_v57, %v360_v56  ;;  %vm367_vm5 = vweird.f32 %v572_v57  ;;  %v383_v56 = vld [vmem:[%s787_s5 + $0x38] sm:$0xff] }
 0x1a9   : > { %vm368_vm7 = vmor %vm366_vm6, %vm367_vm5 }
 0x1aa   : > { %v363_v59 = vsub.f32 1.0, %v362_v58 }
 0x1ac   : > { %v364_v61 = vmul.f32 %v572_v57, %v363_v59  ;;  %v391_v59 = vld [vmem:[%s787_s5 + $0x78] sm:$0xff] }
 0x1ae   : > { %v365_v63 = vadd.f32 %v572_v57, %v364_v61 }
 0x1b0   : > { %v369_v5 = vsel %vm368_vm7, %v572_v57, %v365_v63 }
 0x1b1   : > { %v374_v7 = vsel %vm371_vm8, %v373_v0, %v369_v5 }
 0x1b2   : > { %v392_v12 = vperm.slane %v374_v7, 0 }
 0x1b4   : > { %415 = vperm.xlu1 %563, %v392_v12   ;;  %409 = vperm.xlu0 %562, %v392_v12  }
 0x1b5   : > { %397 = vperm.xlu2 %560, %v392_v12  }
 0x1bc   : > { %568 = vset.pattern.permute.xlu0 %v437_v15 }
 0x1bd   : > { %561 = vset.pattern.permute.xlu2 %v401_v13 }
 0x1c5   : > { %403 = vperm.xlu2 %561, %v392_v12  }
 0x1cd   : > { %564 = vset.pattern.permute.xlu2 %v419_v14 }
 0x1d5   : > { %421 = vperm.xlu2 %564, %v392_v12  }
 0x1dd   : > { %565 = vset.pattern.permute.xlu2 %v425_v16 }
 0x1e5   : > { %427 = vperm.xlu2 %565, %v392_v12  }
 0x1ed   : > { %566 = vset.pattern.permute.xlu2 %v431_v17 }
 0x1f5   : > { %433 = vperm.xlu2 %566, %v392_v12  }
 0x1fd   : > { %567 = vset.pattern.permute.xlu2 %v437_v15 }
 0x205   : > { %439 = vperm.xlu2 %567, %v392_v12  }
 0x20f   : > { %v398_v18 = vpop.permute.xlu2 %397 }
 0x210   : > { %v441_v22 = vmul.f32 %v398_v18, %v376_v20  ;;  %v442_v23 = vmul.f32 %v398_v18, %v377_v21 }
 0x212   : > { %v449_v26 = vadd.f32 %v441_v22, %v635_v2  ;;  %v450_v27 = vadd.f32 %v442_v23, %v637_v3  ;;  %v378_v2 = vld [vmem:[%s787_s5 + $0x10] sm:$0xff]  ;;  %v379_v3 = vld [vmem:[%s787_s5 + $0x18] sm:$0xff] }
 0x21f   : > { %v404_v19 = vpop.permute.xlu2 %403 }
 0x220   : > { %v443_v32 = vmul.f32 %v404_v19, %v378_v2  ;;  %v444_v33 = vmul.f32 %v404_v19, %v379_v3 }
 0x222   : > { %v451_v37 = vadd.f32 %v443_v32, %v647_v8  ;;  %v452_v38 = vadd.f32 %v444_v33, %v649_v9  ;;  %v388_v9 = vld [vmem:[%s787_s5 + $0x60] sm:$0xff] }
 0x226   : > { %v410_v45 = vpop.permute.xlu0 %409  ;;  %v416_v57 = vpop.permute.xlu1 %415 }
 0x227   : > { %v445_v8 = vmul.f32 %v410_v45, %v380_v43  ;;  %v446_v46 = vmul.f32 %v410_v45, %v381_v44  ;;  %v448_v58 = vmul.f32 %v416_v57, %v383_v56 }
 0x229   : > { %v453_v49 = vadd.f32 %v445_v8, %v639_v4  ;;  %v454_v50 = vadd.f32 %v446_v46, %v643_v6  ;;  %v447_v4 = vmul.f32 %v416_v57, %v382_v55  ;;  %v390_v6 = vld [vmem:[%s787_s5 + $0x70] sm:$0xff]  ;;  %v456_v62 = vadd.f32 %v448_v58, %v653_v11 }
 0x22b   : > { %v455_v61 = vadd.f32 %v447_v4, %v651_v10 }
 0x22f   : > { %v422_v25 = vpop.permute.xlu2 %421 }
 0x230   : > { %v457_v28 = vmul.f32 %v422_v25, %v384_v1  ;;  %v458_v29 = vmul.f32 %v422_v25, %v385_v24 }
 0x232   : > { %v465_v30 = vadd.f32 %v457_v28, %v449_v26  ;;  %v466_v31 = vadd.f32 %v458_v29, %v450_v27 }
 0x234   : > { %473 = vst [vmem:[%s727_s20] sm:$0xff] %v465_v30 }
 0x235   : > { %474 = vst [vmem:[%s727_s20 + $0x8] sm:$0xff] %v466_v31 }
 0x23f   : > { %v428_v36 = vpop.permute.xlu2 %427 }
 0x240   : > { %v459_v39 = vmul.f32 %v428_v36, %v386_v34  ;;  %v460_v40 = vmul.f32 %v428_v36, %v387_v35 }
 0x242   : > { %v467_v41 = vadd.f32 %v459_v39, %v451_v37  ;;  %v468_v42 = vadd.f32 %v460_v40, %v452_v38 }
 0x244   : > { %475 = vst [vmem:[%s727_s20 + $0x10] sm:$0xff] %v467_v41 }
 0x245   : > { %476 = vst [vmem:[%s727_s20 + $0x18] sm:$0xff] %v468_v42 }
 0x24f   : > { %v434_v48 = vpop.permute.xlu2 %433 }
 0x250   : > { %v461_v51 = vmul.f32 %v434_v48, %v388_v9  ;;  %v462_v52 = vmul.f32 %v434_v48, %v389_v47 }
 0x252   : > { %v469_v53 = vadd.f32 %v461_v51, %v453_v49  ;;  %v470_v54 = vadd.f32 %v462_v52, %v454_v50 }
 0x254   : > { %477 = vst [vmem:[%s727_s20 + $0x20] sm:$0xff] %v469_v53 }
 0x255   : > { %478 = vst [vmem:[%s727_s20 + $0x28] sm:$0xff] %v470_v54 }
 0x25f   : > { %v440_v60 = vpop.permute.xlu2 %439 }
 0x260   : > { %v463_v63 = vmul.f32 %v440_v60, %v390_v6  ;;  %v464_v0 = vmul.f32 %v440_v60, %v391_v59 }
 0x262   : > { %v471_v5 = vadd.f32 %v463_v63, %v455_v61  ;;  %v472_v7 = vadd.f32 %v464_v0, %v456_v62 }
 0x264   : > { %479 = vst [vmem:[%s727_s20 + $0x30] sm:$0xff] %v471_v5 }
 0x265   : > { %480 = vst [vmem:[%s727_s20 + $0x38] sm:$0xff] %v472_v7 }
 0x266 PF: > { %s16_s21 = sadd.s32 1, %s579_s21  }
 0x267   : > { %p13_p4 = scmp.ge.s32.totalorder %s16_s21, 4  }
 0x269   :  { %15 = sbr.rel (!%p13_p4) target bundleno = 1 (0x1), region = 74 }

</bundles_post_ra>
